<compile_context>
chip_gen: v5e
topology: v5e:2x2
jax: 0.10.0
libtpu: 0.0.40
codegen_flags: <defaults>
</compile_context>

<pallas_src>
import jax
import jax.numpy as jnp
from jax.experimental import pallas as pl
from jax.experimental.pallas import tpu as pltpu

BN_EPS = 1e-5


def _reranker_kernel(
    x_ref,            # [TB, input_dim]   bf16
    w1_ref, b1_ref,   # [input_dim, H] bf16 (BN-folded), [1, H] f32
    w2_ref, b2_ref,   # [H, H]        bf16 (BN-folded), [1, H] f32
    w3_ref, b3_ref,   # [1, H] f32 (row of final weight), [1, 1] f32
    o_ref,            # [TB, 1] f32
):
    x = x_ref[...]

    # ---- Layer 1: Linear (BN folded) + ReLU (+ Dropout = identity) ----
    h = jnp.dot(x, w1_ref[...], preferred_element_type=jnp.float32) + b1_ref[...]
    h = jnp.maximum(h, 0.0)

    # ---- Layer 2: Linear (BN folded) + ReLU (+ Dropout = identity) ----
    h = jnp.dot(h.astype(jnp.bfloat16), w2_ref[...],
                preferred_element_type=jnp.float32) + b2_ref[...]
    h = jnp.maximum(h, 0.0)

    # ---- Layer 3: score head (output_dim = 1) on VPU + lane reduction ----
    # (keeps the MXU free for the two 128-wide matmuls; output stays [TB, 1])
    out = jnp.sum(h * w3_ref[...], axis=-1, keepdims=True) + b3_ref[...]
    o_ref[...] = out.astype(o_ref.dtype)


def reranker_forward(x, params):
    """x: [B, input_dim] float32. params: dict of weights (see init_params)."""
    batch, input_dim = x.shape
    hidden_dim = params["w1"].shape[1]
    output_dim = params["w3"].shape[1]
    assert output_dim == 1, "fused score-head path assumes output_dim == 1"

    # ---- Fold BatchNorm1d (eval) into the linear layers (done once, in f32) ----
    scale1 = params["g1"] * jax.lax.rsqrt(params["v1"] + BN_EPS)          # [1, H]
    w1f = (params["w1"] * scale1).astype(jnp.bfloat16)                    # [in, H]
    b1f = (params["b1"] - params["m1"]) * scale1 + params["be1"]          # [1, H] f32

    scale2 = params["g2"] * jax.lax.rsqrt(params["v2"] + BN_EPS)
    w2f = (params["w2"] * scale2).astype(jnp.bfloat16)                    # [H, H]
    b2f = (params["b2"] - params["m2"]) * scale2 + params["be2"]          # [1, H] f32

    w3r = params["w3"].T.astype(jnp.float32)                              # [1, H] f32
    b3 = params["b3"].astype(jnp.float32)                                 # [1, 1] f32

    xb = x.astype(jnp.bfloat16)

    # ---- Batch tiling: 1-D grid, double-buffered x/out, resident weights ----
    tile_b = batch if batch <= 512 else 512
    grid = (pl.cdiv(batch, tile_b),)

    const = lambda i: (0, 0)  # weights: same block every step -> stay in VMEM
    in_specs = [
        pl.BlockSpec((tile_b, input_dim), lambda i: (i, 0)),   # x tile
        pl.BlockSpec((input_dim, hidden_dim), const),          # w1f
        pl.BlockSpec((1, hidden_dim), const),                  # b1f
        pl.BlockSpec((hidden_dim, hidden_dim), const),         # w2f
        pl.BlockSpec((1, hidden_dim), const),                  # b2f
        pl.BlockSpec((1, hidden_dim), const),                  # w3 row
        pl.BlockSpec((1, 1), const),                           # b3
    ]
    out_specs = pl.BlockSpec((tile_b, output_dim), lambda i: (i, 0))

    flops = 2 * batch * (input_dim * hidden_dim + hidden_dim * hidden_dim + hidden_dim)
    bytes_accessed = (
        batch * input_dim * 2                                   # x (bf16)
        + (input_dim * hidden_dim + hidden_dim * hidden_dim) * 2  # weights (bf16)
        + (3 * hidden_dim + 1) * 4                              # biases + w3 row (f32)
        + batch * output_dim * 4                                # output (f32)
    )

    return pl.pallas_call(
        _reranker_kernel,
        out_shape=jax.ShapeDtypeStruct((batch, output_dim), jnp.float32),
        grid=grid,
        in_specs=in_specs,
        out_specs=out_specs,
        compiler_params=pltpu.CompilerParams(
            dimension_semantics=("parallel",),
            vmem_limit_bytes=32 * 1024 * 1024,
        ),
        cost_estimate=pl.CostEstimate(
            flops=flops, transcendentals=0, bytes_accessed=bytes_accessed
        ),
    )(xb, w1f, b1f, w2f, b2f, w3r, b3)


def init_params(key, input_dim=64, hidden_dim=128, output_dim=1):
    """Deterministic synthetic parameter init (PyTorch-style shapes, pre-transposed)."""
    ks = jax.random.split(key, 8)

    def linear(kw, kb, fan_in, fan_out):
        bound = 1.0 / jnp.sqrt(fan_in)
        # stored as [in, out] so kernel does x @ W
        w = jax.random.uniform(kw, (fan_in, fan_out), jnp.float32, -bound, bound)
        b = jax.random.uniform(kb, (1, fan_out), jnp.float32, -bound, bound)
        return w, b

    w1, b1 = linear(ks[0], ks[1], input_dim, hidden_dim)
    w2, b2 = linear(ks[2], ks[3], hidden_dim, hidden_dim)
    w3, b3 = linear(ks[4], ks[5], hidden_dim, output_dim)

    # BatchNorm1d params (eval-mode running stats), non-trivial but deterministic
    g1 = 1.0 + 0.1 * jax.random.normal(ks[6], (1, hidden_dim), jnp.float32)
    be1 = 0.05 * jax.random.normal(ks[7], (1, hidden_dim), jnp.float32)
    m1 = 0.01 * jnp.arange(hidden_dim, dtype=jnp.float32).reshape(1, hidden_dim)
    v1 = 1.0 + 0.02 * jnp.arange(hidden_dim, dtype=jnp.float32).reshape(1, hidden_dim)

    g2 = jnp.ones((1, hidden_dim), jnp.float32)
    be2 = jnp.zeros((1, hidden_dim), jnp.float32)
    m2 = jnp.zeros((1, hidden_dim), jnp.float32)
    v2 = jnp.ones((1, hidden_dim), jnp.float32)

    return dict(
        w1=w1, b1=b1, g1=g1, be1=be1, m1=m1, v1=v1,
        w2=w2, b2=b2, g2=g2, be2=be2, m2=m2, v2=v2,
        w3=w3, b3=b3,
    )


def reranker_ref(x, p):
    """Pure-JAX f32 reference for validation."""
    h = x @ p["w1"] + p["b1"]
    h = (h - p["m1"]) / jnp.sqrt(p["v1"] + BN_EPS) * p["g1"] + p["be1"]
    h = jnp.maximum(h, 0.0)
    h = h @ p["w2"] + p["b2"]
    h = (h - p["m2"]) / jnp.sqrt(p["v2"] + BN_EPS) * p["g2"] + p["be2"]
    h = jnp.maximum(h, 0.0)
    return h @ p["w3"] + p["b3"]


if __name__ == "__main__":
    key = jax.random.PRNGKey(0)
    k_param, k_x = jax.random.split(key)

    input_dim, hidden_dim, output_dim = 64, 128, 1
    batch = 8

    params = init_params(k_param, input_dim, hidden_dim, output_dim)
    x = jax.random.normal(k_x, (batch, input_dim), jnp.float32)

    out = reranker_forward(x, params)
    out = jax.block_until_ready(out)

    ref = reranker_ref(x, params)
    assert out.shape == (batch, output_dim), out.shape
    # bf16 MXU operands -> relaxed tolerance vs. the f32 reference
    assert jnp.allclose(out, ref, atol=5e-2, rtol=5e-2), (
        float(jnp.max(jnp.abs(out - ref)))
    )

    print("KERNEL_OK")
</pallas_src>

<mosaic_0001>
module attributes {stable_mosaic.version = 11 : i64} {
  func.func @_reranker_kernel(%arg0: i32, %arg1: memref<8x64xbf16, #tpu.memory_space<vmem>>, %arg2: memref<64x128xbf16, #tpu.memory_space<vmem>>, %arg3: memref<1x128xf32, #tpu.memory_space<vmem>>, %arg4: memref<128x128xbf16, #tpu.memory_space<vmem>>, %arg5: memref<1x128xf32, #tpu.memory_space<vmem>>, %arg6: memref<1x128xf32, #tpu.memory_space<vmem>>, %arg7: memref<1x1xf32, #tpu.memory_space<vmem>>, %arg8: memref<8x1xf32, #tpu.memory_space<vmem>>) attributes {dimension_semantics = [#tpu.dimension_semantics<parallel>], iteration_bounds = array<i64: 1>, scalar_prefetch = 0 : i64, scratch_operands = 0 : i64, tpu.core_type = #tpu.core_type<tc>, window_params = [{transform_indices = @transform_0, window_bounds = array<i64: 8, 64>}, {pipeline_mode = #tpu.pipeline_mode<synchronous>, transform_indices = @transform_1, window_bounds = array<i64: 64, 128>}, {pipeline_mode = #tpu.pipeline_mode<synchronous>, transform_indices = @transform_2, window_bounds = array<i64: 1, 128>}, {pipeline_mode = #tpu.pipeline_mode<synchronous>, transform_indices = @transform_3, window_bounds = array<i64: 128, 128>}, {pipeline_mode = #tpu.pipeline_mode<synchronous>, transform_indices = @transform_4, window_bounds = array<i64: 1, 128>}, {pipeline_mode = #tpu.pipeline_mode<synchronous>, transform_indices = @transform_5, window_bounds = array<i64: 1, 128>}, {pipeline_mode = #tpu.pipeline_mode<synchronous>, transform_indices = @transform_6, window_bounds = array<i64: 1, 1>}, {transform_indices = @transform_7, window_bounds = array<i64: 8, 1>}]} {
    %c0 = arith.constant 0 : index
    %c0_0 = arith.constant 0 : index
    %0 = vector.load %arg1[%c0, %c0_0] : memref<8x64xbf16, #tpu.memory_space<vmem>>, vector<8x64xbf16>
    %c0_1 = arith.constant 0 : index
    %c0_2 = arith.constant 0 : index
    %1 = vector.load %arg2[%c0_1, %c0_2] : memref<64x128xbf16, #tpu.memory_space<vmem>>, vector<64x128xbf16>
    %cst = arith.constant dense<0.000000e+00> : vector<8x128xf32>
    %2 = tpu.matmul %0, %1, %cst {dimension_numbers = #tpu.dot_dimension_numbers<[1], [0], [0], [1], [0, 0, 1, 1], [], []>} : vector<8x64xbf16>, vector<64x128xbf16>, vector<8x128xf32> -> vector<8x128xf32>
    %c0_3 = arith.constant 0 : index
    %c0_4 = arith.constant 0 : index
    %3 = vector.load %arg3[%c0_3, %c0_4] : memref<1x128xf32, #tpu.memory_space<vmem>>, vector<1x128xf32>
    %4 = vector.broadcast %3 : vector<1x128xf32> to vector<8x128xf32>
    %5 = arith.addf %2, %4 : vector<8x128xf32>
    %cst_5 = arith.constant 0.000000e+00 : f32
    %6 = vector.broadcast %cst_5 : f32 to vector<8x128xf32>
    %7 = arith.maximumf %5, %6 : vector<8x128xf32>
    %8 = arith.truncf %7 : vector<8x128xf32> to vector<8x128xbf16>
    %c0_6 = arith.constant 0 : index
    %c0_7 = arith.constant 0 : index
    %9 = vector.load %arg4[%c0_6, %c0_7] : memref<128x128xbf16, #tpu.memory_space<vmem>>, vector<128x128xbf16>
    %cst_8 = arith.constant dense<0.000000e+00> : vector<8x128xf32>
    %10 = tpu.matmul %8, %9, %cst_8 {dimension_numbers = #tpu.dot_dimension_numbers<[1], [0], [0], [1], [0, 0, 1, 1], [], []>} : vector<8x128xbf16>, vector<128x128xbf16>, vector<8x128xf32> -> vector<8x128xf32>
    %c0_9 = arith.constant 0 : index
    %c0_10 = arith.constant 0 : index
    %11 = vector.load %arg5[%c0_9, %c0_10] : memref<1x128xf32, #tpu.memory_space<vmem>>, vector<1x128xf32>
    %12 = vector.broadcast %11 : vector<1x128xf32> to vector<8x128xf32>
    %13 = arith.addf %10, %12 : vector<8x128xf32>
    %cst_11 = arith.constant 0.000000e+00 : f32
    %14 = vector.broadcast %cst_11 : f32 to vector<8x128xf32>
    %15 = arith.maximumf %13, %14 : vector<8x128xf32>
    %c0_12 = arith.constant 0 : index
    %c0_13 = arith.constant 0 : index
    %16 = vector.load %arg6[%c0_12, %c0_13] : memref<1x128xf32, #tpu.memory_space<vmem>>, vector<1x128xf32>
    %17 = vector.broadcast %16 : vector<1x128xf32> to vector<8x128xf32>
    %18 = arith.mulf %15, %17 : vector<8x128xf32>
    %cst_14 = arith.constant dense<0.000000e+00> : vector<8xf32>
    %19 = vector.multi_reduction <add>, %18, %cst_14 [1] : vector<8x128xf32> to vector<8xf32>
    %20 = vector.shape_cast %19 : vector<8xf32> to vector<8x1xf32>
    %c0_15 = arith.constant 0 : index
    %c0_16 = arith.constant 0 : index
    %21 = vector.load %arg7[%c0_15, %c0_16] : memref<1x1xf32, #tpu.memory_space<vmem>>, vector<1x1xf32>
    %22 = vector.broadcast %21 : vector<1x1xf32> to vector<8x1xf32>
    %23 = arith.addf %20, %22 : vector<8x1xf32>
    %c0_17 = arith.constant 0 : index
    %c0_18 = arith.constant 0 : index
    %24 = vector.load %arg8[%c0_17, %c0_18] : memref<8x1xf32, #tpu.memory_space<vmem>>, vector<8x1xf32>
    tpu.vector_store %arg8[%c0_17, %c0_18], %23 {strides = array<i32>} : memref<8x1xf32, #tpu.memory_space<vmem>>, vector<8x1xf32>,
    return
  }
  func.func @transform_0(%arg0: i32) -> (i32, i32) {
    %c0_i32 = arith.constant 0 : i32
    %c0_i32_0 = arith.constant 0 : i32
    return %arg0, %c0_i32 : i32, i32
  }
  func.func @transform_1(%arg0: i32) -> (i32, i32) {
    %c0_i32 = arith.constant 0 : i32
    %c0_i32_0 = arith.constant 0 : i32
    %c0_i32_1 = arith.constant 0 : i32
    return %c0_i32, %c0_i32_0 : i32, i32
  }
  func.func @transform_2(%arg0: i32) -> (i32, i32) {
    %c0_i32 = arith.constant 0 : i32
    %c0_i32_0 = arith.constant 0 : i32
    %c0_i32_1 = arith.constant 0 : i32
    return %c0_i32, %c0_i32_0 : i32, i32
  }
  func.func @transform_3(%arg0: i32) -> (i32, i32) {
    %c0_i32 = arith.constant 0 : i32
    %c0_i32_0 = arith.constant 0 : i32
    %c0_i32_1 = arith.constant 0 : i32
    return %c0_i32, %c0_i32_0 : i32, i32
  }
  func.func @transform_4(%arg0: i32) -> (i32, i32) {
    %c0_i32 = arith.constant 0 : i32
    %c0_i32_0 = arith.constant 0 : i32
    %c0_i32_1 = arith.constant 0 : i32
    return %c0_i32, %c0_i32_0 : i32, i32
  }
  func.func @transform_5(%arg0: i32) -> (i32, i32) {
    %c0_i32 = arith.constant 0 : i32
    %c0_i32_0 = arith.constant 0 : i32
    %c0_i32_1 = arith.constant 0 : i32
    return %c0_i32, %c0_i32_0 : i32, i32
  }
  func.func @transform_6(%arg0: i32) -> (i32, i32) {
    %c0_i32 = arith.constant 0 : i32
    %c0_i32_0 = arith.constant 0 : i32
    %c0_i32_1 = arith.constant 0 : i32
    return %c0_i32, %c0_i32_0 : i32, i32
  }
  func.func @transform_7(%arg0: i32) -> (i32, i32) {
    %c0_i32 = arith.constant 0 : i32
    %c0_i32_0 = arith.constant 0 : i32
    return %arg0, %c0_i32 : i32, i32
  }
}

</mosaic_0001>

<bundles_post_ra>
// kernel: tpu_custom_call.1
= control target key start
LH: loop header
LB: loop body
LE: loop exit
PB: predicated region body
PF: predicated region fallthrough
CT: control target
= control target key end

     0   :  { %s447_s0 = inlined_call_operand.hbm [shape: bf16[8,64], index: 0, kind: input, shape index: {}]   ;;  %s448_s1 = inlined_call_operand.hbm [shape: bf16[64,128], index: 1, kind: input, shape index: {}]   ;;  %s449_s2 = inlined_call_operand.vmem [shape: f32[1,128], index: 2, kind: input, shape index: {}]   ;;  %s450_s3 = inlined_call_operand.hbm [shape: bf16[128,128], index: 3, kind: input, shape index: {}]   ;;  %s451_s4 = inlined_call_operand.vmem [shape: f32[1,128], index: 4, kind: input, shape index: {}]   ;;  %s452_s5 = inlined_call_operand.vmem [shape: f32[1,128], index: 5, kind: input, shape index: {}]   ;;  %s453_s6 = inlined_call_operand.<no memory space> [shape: f32[1,1], index: 6, kind: input, shape index: {}]   ;;  %s454_s7 = inlined_call_operand.vmem [shape: f32[8,1], index: 7, kind: output, shape index: {}]  }
   0x1   :  { %v12_v0 = vstv %s453_s6 }
   0x2   :  { %13 = vst [vmem:[#allocation2] sm:$0x1] %v12_v0 }
   0x3   :  { %14 = vsyncpa [#allocation4], 0 }
   0x4   :  { %15 = vsyncpa [#allocation6], 0  ;;  %s31_s28 = sshll.u32 %s448_s1, 4  ;;  %s378_s29 = smov [#allocation5]   ;;  %s32_s28 = int_to_ptr.hbm [resolvable:$true] %s31_s28 }
   0x5   :  { %s33_s30 = sshll.u32 %s378_s29, 4  ;;  %s21_s10 = sshll.u32 %s447_s0, 4  ;;  %s34_s30 = int_to_ptr.vmem [resolvable:$true] %s33_s30  ;;  %s22_s10 = int_to_ptr.hbm [resolvable:$true] %s21_s10 }
   0x6   :  { %s379_s11 = smov 64   ;;  %s380_s12 = smov 4  }
   0x7   :  { %39 = dma.hbm_to_vmem [thread:$0]  %s32_s28, 512, %s34_s30, [#allocation6], %s379_s11, %s379_s11, %s380_s12  }
   0x8   :  { %s381_s6 = smov [#allocation3]   ;;  %s46_s16 = sshll.u32 %s450_s3, 4  ;;  %s47_s16 = int_to_ptr.hbm [resolvable:$true] %s46_s16 }
   0x9   :  { %s23_s13 = sshll.u32 %s381_s6, 4  ;;  %s382_s1 = smov [#allocation7]   ;;  %s24_s13 = int_to_ptr.vmem [resolvable:$true] %s23_s13 }
   0xa   :  { %26 = dma.hbm_to_vmem [thread:$0]  %s22_s10, 64, %s24_s13, [#allocation4]  }
   0xb   :  { %s48_s17 = sshll.u32 %s382_s1, 4  ;;  %s49_s17 = int_to_ptr.vmem [resolvable:$true] %s48_s17 }
   0xc   :  { %54 = dma.hbm_to_vmem [thread:$0]  %s47_s16, 1024, %s49_s17, [#allocation6], %s379_s11, %s379_s11, %s380_s12  }
   0xd   :  { %374 = dma.done.wait [#allocation4], 64  }
   0xe   :  { %375 = vsyncadd [#allocation4], 4294967232 }
   0xf   :  { %376 = dma.done.wait [#allocation6], 1536  }
  0x10   :  { %377 = vsyncadd [#allocation6], 4294965760  ;;  %v284_v1 = vld [vmem:[#allocation5 + $0x18] sm:$0xff]  ;;  %v283_v3 = vld [vmem:[#allocation5 + $0x10] sm:$0xff]  ;;  %vm111_vm0 = vcmask 523264   ;;  %vm224_vm1 = vcmask 7168  }
  0x11   :  { %v292_v2 = vld [vmem:[#allocation7 + $0x38] sm:$0xff]  ;;  %119 = vmatpush.bf16.msra.mxu0 %v284_v1  ;;  %v291_v4 = vld [vmem:[#allocation7 + $0x30] sm:$0xff]  ;;  %v282_v5 = vld [vmem:[#allocation5 + $0x8] sm:$0xff] }
  0x12   :  { %198 = vmatpush.bf16.msra.mxu1 %v292_v2  ;;  %v290_v6 = vld [vmem:[#allocation7 + $0x28] sm:$0xff]  ;;  %v281_v7 = vld [vmem:[#allocation5] sm:$0xff]  ;;  %v74_v9 = vld [vmem:[#allocation3] sm:$0xf] }
  0x13   :  { %v289_v8 = vld [vmem:[#allocation7 + $0x20] sm:$0xff]  ;;  %v288_v10 = vld [vmem:[#allocation7 + $0x18] sm:$0xff]  ;;  %v287_v11 = vld [vmem:[#allocation7 + $0x10] sm:$0xff] }
  0x14   :  { %v286_v12 = vld [vmem:[#allocation7 + $0x8] sm:$0xff]  ;;  %v285_v13 = vld [vmem:[#allocation7] sm:$0xff]  ;;  %v298_v14 = vld [vmem:[%s449_s2] ss:$0 sm:$0xff] }
  0x15   :  { %120 = vmatpush.bf16.msra.mxu0 %v283_v3  ;;  %v299_v20 = vld [vmem:[%s451_s4] ss:$0 sm:$0xff] }
  0x16   :  { %199 = vmatpush.bf16.msra.mxu1 %v291_v4  ;;  %v300_v23 = vld [vmem:[%s452_s5] ss:$0 sm:$0xff] }
  0x17   :  { %v301_v27 = vld [vmem:[#allocation2] ss:$0 sm:$0xff] }
  0x19   :  { %121 = vmatpush.bf16.msra.mxu0 %v282_v5 }
  0x1a   :  { %200 = vmatpush.bf16.msra.mxu1 %v290_v6 }
  0x1d   :  { %122 = vmatpush.bf16.msra.mxu0 %v281_v7 }
  0x1e   :  { %201 = vmatpush.bf16.msra.mxu1 %v289_v8 }
  0x20   :  { %248 = vmatmul.msk.bf16.vlgmr.msra.gmra.mxu0 %vm111_vm0, %v74_v9 }
  0x22   :  { %202 = vmatpush.bf16.msra.mxu1 %v288_v10 }
  0x26   :  { %203 = vmatpush.bf16.msra.mxu1 %v287_v11 }
  0x2a   :  { %204 = vmatpush.bf16.msra.mxu1 %v286_v12 }
  0x2e   :  { %205 = vmatpush.bf16.msra.mxu1 %v285_v13 }
  0x9d   :  { %v124_v15 = vpop.f32.mrf.mxu0 }
  0x9e   :  { %v125_v16 = vadd.f32 %v298_v14, %v124_v15 }
  0xa0   :  { %v128_v17 = vmax.f32 %v125_v16, 0.0 }
  0xa2   :  { %v129_v18 = vpack.c.bf16 %v128_v17, %v128_v17 }
  0xa4   :  { %206 = vmatmul.bf16.vlgmr.msra.gmra.mxu1 %v129_v18 }
  0xa5   :  { %v126_v19 = vpop.f32.mrf.mxu0 }
 0x121   :  { %v207_v21 = vpop.f32.mrf.mxu1 }
 0x122   :  { %v208_v22 = vadd.f32 %v299_v20, %v207_v21 }
 0x124   :  { %v211_v24 = vmax.f32 %v208_v22, 0.0 }
 0x126   :  { %v216_v25 = vmul.f32 %v300_v23, %v211_v24 }
 0x128   :  { %217 = vadd.xlane.f32.xlu0 %v216_v25 }
 0x129   :  { %v209_v26 = vpop.f32.mrf.mxu1 }
 0x19b   :  { %v218_v28 = vpop.xlane.xlu0 %217 }
 0x19c   :  { %v223_v29 = vadd.f32 %v301_v27, %v218_v28 }
 0x19e   :  { %225 = vst.msk [vmem:[%s454_s7] sm:$0xff] %vm224_vm1, %v223_v29 }
 0x19f   :  { %230 = vsyncpa [#allocation4], 1 }
 0x1a0   :  { %231 = vsyncpa [#allocation6], 1 }

</bundles_post_ra>
